<compile_context>
chip_gen: v5e
topology: v5e:2x2
jax: 0.10.0
libtpu: 0.0.40
codegen_flags: <defaults>
</compile_context>

<pallas_src>
import math

import jax
import jax.numpy as jnp
from jax.experimental import pallas as pl
from jax.experimental.pallas import tpu as pltpu

SAMPLE_RATE = 16000          # torchaudio MFCC default

N_FFT = 321
HOP = N_FFT // 2             # 160 (torchaudio default hop = win_length // 2)
N_FREQS = N_FFT // 2 + 1     # 161 (onesided)
N_FFT_PAD = 384              # 321 -> next multiple of 128 (zero rows in DFT matrix)
N_FREQS_PAD = 256            # 161 -> next multiple of 128 (zero cols/rows)
OUT_PAD = 128                # lane-dense output width; slice [..., :n_mfcc] outside
MAX_TF = 512                 # frame-tile cap (v7x 64 MiB VMEM friendly)


# ---------------------------------------------------------------------------
# Constant-matrix construction (deterministic "parameters", plain JAX glue)
# ---------------------------------------------------------------------------
def _hz_to_mel(f):
    return 2595.0 * jnp.log10(1.0 + f / 700.0)


def _mel_to_hz(m):
    return 700.0 * (10.0 ** (m / 2595.0) - 1.0)


def melscale_fbanks(n_freqs, f_min, f_max, n_mels, sample_rate):
    """torchaudio.functional.melscale_fbanks (mel_scale='htk', norm=None)."""
    all_freqs = jnp.linspace(0.0, sample_rate // 2, n_freqs)
    m_min = _hz_to_mel(f_min)
    m_max = _hz_to_mel(f_max)
    m_pts = jnp.linspace(m_min, m_max, n_mels + 2)
    f_pts = _mel_to_hz(m_pts)
    f_diff = f_pts[1:] - f_pts[:-1]                      # (n_mels+1,)
    slopes = f_pts[None, :] - all_freqs[:, None]         # (n_freqs, n_mels+2)
    down_slopes = -slopes[:, :-2] / f_diff[:-1]
    up_slopes = slopes[:, 2:] / f_diff[1:]
    fb = jnp.maximum(0.0, jnp.minimum(down_slopes, up_slopes))
    return fb.astype(jnp.float32)                        # (n_freqs, n_mels)


def create_dct(n_mfcc, n_mels):
    """torchaudio.functional.create_dct with norm='ortho'; returns (n_mels, n_mfcc)."""
    n = jnp.arange(n_mels, dtype=jnp.float32)
    k = jnp.arange(n_mfcc, dtype=jnp.float32)[:, None]
    dct = jnp.cos(math.pi / n_mels * (n[None, :] + 0.5) * k)    # (n_mfcc, n_mels)
    dct = dct.at[0].multiply(1.0 / math.sqrt(2.0))
    dct = dct * math.sqrt(2.0 / n_mels)
    return dct.T.astype(jnp.float32)                             # (n_mels, n_mfcc)


def build_dft_matrix():
    """Hann-folded, zero-padded, fused [cos | -sin] one-sided real-DFT matrix.

    Shape (N_FFT_PAD, 2*N_FREQS_PAD): columns [0:256] real part, [256:512] imag part.
    Phase uses exact integer (t*k) mod n_fft to avoid f32 argument-reduction error.
    """
    t = jnp.arange(N_FFT, dtype=jnp.int32)
    k = jnp.arange(N_FREQS, dtype=jnp.int32)
    mod = (t[:, None] * k[None, :]) % N_FFT                      # exact, small ints
    ang = (2.0 * math.pi / N_FFT) * mod.astype(jnp.float32)
    # periodic hann window (torch.hann_window(n_fft, periodic=True)), folded in
    hann = 0.5 * (1.0 - jnp.cos(2.0 * math.pi *
                                jnp.arange(N_FFT, dtype=jnp.float32) / N_FFT))
    cos_m = jnp.cos(ang) * hann[:, None]                         # (321, 161)
    sin_m = -jnp.sin(ang) * hann[:, None]
    dft = jnp.zeros((N_FFT_PAD, 2 * N_FREQS_PAD), jnp.float32)
    dft = dft.at[:N_FFT, :N_FREQS].set(cos_m)
    dft = dft.at[:N_FFT, N_FREQS_PAD:N_FREQS_PAD + N_FREQS].set(sin_m)
    return dft                                                   # (384, 512)


# ---------------------------------------------------------------------------
# Pallas kernel: per (batch, frame-tile)  DFT -> power -> mel -> dB -> DCT
# ---------------------------------------------------------------------------
def mfcc_kernel(frames_ref, dft_ref, mel_ref, dct_ref, out_ref):
    fr = frames_ref[...]                                             # (TF, 384)
    # fused real+imag DFT (hann already folded into dft matrix)
    y = jnp.dot(fr, dft_ref[...], preferred_element_type=jnp.float32)    # (TF, 512)
    re = y[:, :N_FREQS_PAD]
    im = y[:, N_FREQS_PAD:]
    power = re * re + im * im                                        # |STFT|^2, (TF, 256)
    mel = jnp.dot(power, mel_ref[...], preferred_element_type=jnp.float32)  # (TF, n_mels)
    db = 10.0 * jnp.log10(jnp.maximum(mel, 1e-10))                   # AmplitudeToDB(power)
    out_ref[...] = jnp.dot(db, dct_ref[...], preferred_element_type=jnp.float32)  # (TF, 128)


# ---------------------------------------------------------------------------
# Wrapper == MFCCEncoder.forward
# ---------------------------------------------------------------------------
def mfcc_encoder_forward(x, dim_encoded):
    n_mels = max(128, dim_encoded)
    pad = N_FFT // 2            # center=True reflect padding

    B = x.shape[0]
    sig = x.reshape(B, -1).astype(jnp.float32)            # x.view(B, -1)

    # center / reflect padding (torch.stft center=True, pad_mode='reflect')
    sig_p = jnp.pad(sig, ((0, 0), (pad, pad)), mode="reflect")
    n_frames = 1 + (sig_p.shape[1] - N_FFT) // HOP

    # frame tiling: TF frames per grid step, F padded up to a multiple of TF
    TF = min(MAX_TF, -(-n_frames // 8) * 8)
    F_pad = -(-n_frames // TF) * TF

    # Build padded frames directly with one gather: extra columns (t >= 321) and
    # extra frames (>= n_frames) hit zero-padded signal / zero DFT rows, so they
    # contribute nothing to valid outputs and are sliced away below.
    need = (F_pad - 1) * HOP + N_FFT_PAD
    sig_pp = jnp.pad(sig_p, ((0, 0), (0, max(0, need - sig_p.shape[1]))))
    idx = jnp.arange(F_pad)[:, None] * HOP + jnp.arange(N_FFT_PAD)[None, :]
    frames = sig_pp[:, idx]                                # (B, F_pad, 384), f32
    # TODO(synk): framing via XLA gather duplicates ~2.4x signal bytes; an in-kernel
    # manual-DMA framing path would cut HBM traffic further on v5e.

    dft = build_dft_matrix()                                              # (384, 512)
    mel_fb = melscale_fbanks(N_FREQS, 0.0, SAMPLE_RATE / 2.0, n_mels, SAMPLE_RATE)
    mel_fb = jnp.pad(mel_fb, ((0, N_FREQS_PAD - N_FREQS), (0, 0)))        # (256, n_mels)
    dct_m = create_dct(dim_encoded, n_mels)                               # (n_mels, d)
    dct_m = jnp.pad(dct_m, ((0, 0), (0, OUT_PAD - dim_encoded)))          # (n_mels, 128)

    grid = (B, F_pad // TF)
    flops = 2 * B * F_pad * (N_FFT_PAD * 2 * N_FREQS_PAD
                             + N_FREQS_PAD * n_mels
                             + n_mels * OUT_PAD)
    bytes_accessed = 4 * (frames.size + dft.size + mel_fb.size + dct_m.size
                          + B * F_pad * OUT_PAD)
    cost = pl.CostEstimate(flops=flops,
                           transcendentals=B * F_pad * n_mels,
                           bytes_accessed=bytes_accessed)

    out = pl.pallas_call(
        mfcc_kernel,
        out_shape=jax.ShapeDtypeStruct((B, F_pad, OUT_PAD), jnp.float32),
        grid_spec=pltpu.PrefetchScalarGridSpec(
            num_scalar_prefetch=0,
            grid=grid,
            in_specs=[
                # leading batch dim squeezed; kernel sees (TF, 384) / (TF, 128)
                pl.BlockSpec((None, TF, N_FFT_PAD), lambda b, f: (b, f, 0)),
                pl.BlockSpec((N_FFT_PAD, 2 * N_FREQS_PAD), lambda b, f: (0, 0)),
                pl.BlockSpec((N_FREQS_PAD, n_mels), lambda b, f: (0, 0)),
                pl.BlockSpec((n_mels, OUT_PAD), lambda b, f: (0, 0)),
            ],
            out_specs=pl.BlockSpec((None, TF, OUT_PAD), lambda b, f: (b, f, 0)),
        ),
        compiler_params=pltpu.CompilerParams(
            dimension_semantics=("parallel", "parallel"),
            vmem_limit_bytes=32 * 1024 * 1024,
        ),
        cost_estimate=cost,
    )(frames, dft, mel_fb, dct_m)

    # drop frame padding and lane padding -> (B, time, n_mfcc) == torch .permute(0, 2, 1)
    return out[:, :n_frames, :dim_encoded]


if __name__ == "__main__":
    dim_encoded = 32
    key = jax.random.PRNGKey(0)
    # small audio batch: (B=2, C=1, T=1600) -> flattened L=1600 -> 10 STFT frames
    x = jax.random.normal(key, (2, 1, 1600), dtype=jnp.float32)

    out = mfcc_encoder_forward(x, dim_encoded)
    out = jax.block_until_ready(out)
    assert out.shape == (2, 10, dim_encoded), out.shape
    assert bool(jnp.all(jnp.isfinite(out)))
    print("KERNEL_OK")
</pallas_src>

<mosaic_0001>
module attributes {stable_mosaic.version = 11 : i64} {
  func.func @mfcc_kernel(%arg0: i32, %arg1: i32, %arg2: memref<1x16x384xf32, #tpu.memory_space<vmem>>, %arg3: memref<384x512xf32, #tpu.memory_space<vmem>>, %arg4: memref<256x128xf32, #tpu.memory_space<vmem>>, %arg5: memref<128x128xf32, #tpu.memory_space<vmem>>, %arg6: memref<1x16x128xf32, #tpu.memory_space<vmem>>) attributes {dimension_semantics = [#tpu.dimension_semantics<parallel>, #tpu.dimension_semantics<parallel>], iteration_bounds = array<i64: 2, 1>, scalar_prefetch = 0 : i64, scratch_operands = 0 : i64, tpu.core_type = #tpu.core_type<tc>, window_params = [{transform_indices = @transform_0, window_bounds = array<i64: 1, 16, 384>}, {pipeline_mode = #tpu.pipeline_mode<synchronous>, transform_indices = @transform_1, window_bounds = array<i64: 384, 512>}, {pipeline_mode = #tpu.pipeline_mode<synchronous>, transform_indices = @transform_2, window_bounds = array<i64: 256, 128>}, {pipeline_mode = #tpu.pipeline_mode<synchronous>, transform_indices = @transform_3, window_bounds = array<i64: 128, 128>}, {transform_indices = @transform_4, window_bounds = array<i64: 1, 16, 128>}]} {
    %c0 = arith.constant 0 : index
    %c0_0 = arith.constant 0 : index
    %c0_1 = arith.constant 0 : index
    %0 = vector.load %arg2[%c0, %c0_0, %c0_1] : memref<1x16x384xf32, #tpu.memory_space<vmem>>, vector<1x16x384xf32>
    %1 = vector.shape_cast %0 : vector<1x16x384xf32> to vector<16x384xf32>
    %c0_2 = arith.constant 0 : index
    %c0_3 = arith.constant 0 : index
    %2 = vector.load %arg3[%c0_2, %c0_3] : memref<384x512xf32, #tpu.memory_space<vmem>>, vector<384x512xf32>
    %cst = arith.constant dense<0.000000e+00> : vector<16x512xf32>
    %3 = tpu.matmul %1, %2, %cst {dimension_numbers = #tpu.dot_dimension_numbers<[1], [0], [0], [1], [0, 0, 1, 1], [], []>} : vector<16x384xf32>, vector<384x512xf32>, vector<16x512xf32> -> vector<16x512xf32>
    %4 = vector.extract_strided_slice %3 {offsets = [0, 0], sizes = [16, 256], strides = [1, 1]} : vector<16x512xf32> to vector<16x256xf32>
    %5 = vector.extract_strided_slice %3 {offsets = [0, 256], sizes = [16, 256], strides = [1, 1]} : vector<16x512xf32> to vector<16x256xf32>
    %6 = arith.mulf %4, %4 : vector<16x256xf32>
    %7 = arith.mulf %5, %5 : vector<16x256xf32>
    %8 = arith.addf %6, %7 : vector<16x256xf32>
    %c0_4 = arith.constant 0 : index
    %c0_5 = arith.constant 0 : index
    %9 = vector.load %arg4[%c0_4, %c0_5] : memref<256x128xf32, #tpu.memory_space<vmem>>, vector<256x128xf32>
    %cst_6 = arith.constant dense<0.000000e+00> : vector<16x128xf32>
    %10 = tpu.matmul %8, %9, %cst_6 {dimension_numbers = #tpu.dot_dimension_numbers<[1], [0], [0], [1], [0, 0, 1, 1], [], []>} : vector<16x256xf32>, vector<256x128xf32>, vector<16x128xf32> -> vector<16x128xf32>
    %cst_7 = arith.constant 1.000000e-10 : f32
    %11 = vector.broadcast %cst_7 : f32 to vector<16x128xf32>
    %12 = arith.maximumf %10, %11 : vector<16x128xf32>
    %13 = math.log %12 : vector<16x128xf32>
    %cst_8 = arith.constant 0.434294492 : f32
    %14 = vector.broadcast %cst_8 : f32 to vector<16x128xf32>
    %15 = arith.mulf %13, %14 : vector<16x128xf32>
    %cst_9 = arith.constant 1.000000e+01 : f32
    %16 = vector.broadcast %cst_9 : f32 to vector<16x128xf32>
    %17 = arith.mulf %16, %15 : vector<16x128xf32>
    %c0_10 = arith.constant 0 : index
    %c0_11 = arith.constant 0 : index
    %18 = vector.load %arg5[%c0_10, %c0_11] : memref<128x128xf32, #tpu.memory_space<vmem>>, vector<128x128xf32>
    %cst_12 = arith.constant dense<0.000000e+00> : vector<16x128xf32>
    %19 = tpu.matmul %17, %18, %cst_12 {dimension_numbers = #tpu.dot_dimension_numbers<[1], [0], [0], [1], [0, 0, 1, 1], [], []>} : vector<16x128xf32>, vector<128x128xf32>, vector<16x128xf32> -> vector<16x128xf32>
    %c0_13 = arith.constant 0 : index
    %c0_14 = arith.constant 0 : index
    %c0_15 = arith.constant 0 : index
    %20 = vector.load %arg6[%c0_13, %c0_14, %c0_15] : memref<1x16x128xf32, #tpu.memory_space<vmem>>, vector<1x16x128xf32>
    %21 = vector.shape_cast %20 : vector<1x16x128xf32> to vector<16x128xf32>
    %22 = vector.shape_cast %19 : vector<16x128xf32> to vector<1x16x128xf32>
    tpu.vector_store %arg6[%c0_13, %c0_14, %c0_15], %22 {strides = array<i32>} : memref<1x16x128xf32, #tpu.memory_space<vmem>>, vector<1x16x128xf32>,
    return
  }
  func.func @transform_0(%arg0: i32, %arg1: i32) -> (i32, i32, i32) {
    %c0_i32 = arith.constant 0 : i32
    %c0_i32_0 = arith.constant 0 : i32
    return %arg0, %arg1, %c0_i32 : i32, i32, i32
  }
  func.func @transform_1(%arg0: i32, %arg1: i32) -> (i32, i32) {
    %c0_i32 = arith.constant 0 : i32
    %c0_i32_0 = arith.constant 0 : i32
    %c0_i32_1 = arith.constant 0 : i32
    return %c0_i32, %c0_i32_0 : i32, i32
  }
  func.func @transform_2(%arg0: i32, %arg1: i32) -> (i32, i32) {
    %c0_i32 = arith.constant 0 : i32
    %c0_i32_0 = arith.constant 0 : i32
    %c0_i32_1 = arith.constant 0 : i32
    return %c0_i32, %c0_i32_0 : i32, i32
  }
  func.func @transform_3(%arg0: i32, %arg1: i32) -> (i32, i32) {
    %c0_i32 = arith.constant 0 : i32
    %c0_i32_0 = arith.constant 0 : i32
    %c0_i32_1 = arith.constant 0 : i32
    return %c0_i32, %c0_i32_0 : i32, i32
  }
  func.func @transform_4(%arg0: i32, %arg1: i32) -> (i32, i32, i32) {
    %c0_i32 = arith.constant 0 : i32
    %c0_i32_0 = arith.constant 0 : i32
    return %arg0, %arg1, %c0_i32 : i32, i32, i32
  }
}

</mosaic_0001>

<bundles_post_ra>
// kernel: tpu_custom_call.1
= control target key start
LH: loop header
LB: loop body
LE: loop exit
PB: predicated region body
PF: predicated region fallthrough
CT: control target
= control target key end

     0   :  { %s1637_s0 = inlined_call_operand.hbm [shape: f32[2,16,384], index: 0, kind: input, shape index: {}]   ;;  %s1638_s1 = inlined_call_operand.hbm [shape: f32[384,512], index: 1, kind: input, shape index: {}]   ;;  %s1639_s2 = inlined_call_operand.hbm [shape: f32[256,128], index: 2, kind: input, shape index: {}]   ;;  %s1640_s3 = inlined_call_operand.hbm [shape: f32[128,128], index: 3, kind: input, shape index: {}]   ;;  %s1641_s4 = inlined_call_operand.hbm [shape: f32[2,16,128], index: 4, kind: output, shape index: {}]  }
   0x1   :  { %1642 = sst [smem:[#allocation15_spill]] %s1638_s1 }
   0x2   :  { %9 = vsyncpa [#allocation3], 0 }
   0x3   :  { %11 = vsyncpa [#allocation3 + $0x1], 0 }
   0x4   :  { %12 = vsyncpa [#allocation6], 0 }
   0x5   :  { %13 = vsyncpa [#allocation9], 0 }
   0x6   :  { %14 = vsyncpa [#allocation4], 0 }
   0x7   :  { %16 = vsyncpa [#allocation4 + $0x1], 0  ;;  %s1429_s15 = smov 0   ;;  %s1431_s16 = smov 0  }
   0x8   :  { %s1433_s17 = smov 0   ;;  %s1435_s18 = smov 0  }
   0x9   :  { %s1437_s19 = smov 0   ;;  %s1439_s20 = smov 0  }
   0xa LB: > { %s1038_s21 = sadd.s32 4294967295, %s1391_s20   ;;  %s1039_s22 = sadd.s32 4294967294, %s1391_s20   ;;  %s1391_s20 = sphi %s1439_s20, %s22_s20   ;;  %s1387_s19 = sphi %s1437_s19, %s1655_s19   ;;  %s1383_s18 = sphi %s1435_s18, %s1654_s18   ;;  %s1379_s17 = sphi %s1433_s17, %s1653_s17   ;;  %s1375_s16 = sphi %s1431_s16, %s1652_s16   ;;  %s1371_s15 = sphi %s1429_s15, %s1651_s15  }
   0xb   : > { %p56_p0 = scmp.ne.s32.totalorder %s1375_s16, %s1371_s15  ;;  %p1463_p1 = scmp.eq.s32.totalorder %s1038_s21, 0 }
   0xc   : > { %p1467_p2 = scmp.eq.s32.totalorder %s1038_s21, 1  ;;  %p151_p3 = scmp.eq.s32.totalorder %s1039_s22, 1 }
   0xd   : > { %p1473_p4 = por %p1463_p1, %p56_p0  ;;  %p1040_p5 = scmp.ge.s32.totalorder %s1391_s20, 1 }
   0xe   : > { %p1478_p6 = por %p151_p3, %p56_p0  ;;  %p158_p7 = scmp.lt.s32.totalorder %s1391_s20, 3 }
   0xf   : > { %s1647_s1 = sld [smem:[#allocation15_spill]]  ;;  %s1393_s5 = smov [#allocation5]  }
  0x10   : > { %p1486_p8 = pnand %p1040_p5, %p158_p7  ;;  %s171_s6 = sshll.u32 %s1393_s5, 4  ;;  %s172_s6 = int_to_ptr.vmem [resolvable:$true] %s171_s6 }
  0x11   : > { %p1044_p11 = scmp.ge.s32.totalorder %s1391_s20, 2  ;;  %s183_s10 = sshll.u32 %s1639_s2, 4  ;;  %s184_s10 = int_to_ptr.hbm [resolvable:$true] %s183_s10 }
  0x12   : > { %p1092_p9 = pneg %p1486_p8  ;;  %s1394_s11 = smov 512  }
  0x13   : > { %s1395_s12 = smov 32   ;;  %s1396_s13 = smov [#allocation7]  }
  0x14   : > { %p1494_p10 = pnand %p1092_p9, %p1463_p1  ;;  %s185_s14 = sshll.u32 %s1396_s13, 4  ;;  %s186_s14 = int_to_ptr.vmem [resolvable:$true] %s185_s14 }
  0x15   : > { %s169_s29 = sshll.u32 %s1647_s1, 4  ;;  %s1397_s21 = smov 128   ;;  %s170_s29 = int_to_ptr.hbm [resolvable:$true] %s169_s29 }
  0x16   : > { %1095 = dma.hbm_to_vmem [thread:$0]  (!%p1494_p10), %s170_s29, 24576, %s172_s6, [#allocation6], %s1394_s11, %s1394_s11, %s1395_s12  }
  0x17   : > { %s1398_s22 = smov 8   ;;  %s197_s5 = sshll.u32 %s1640_s3, 4  ;;  %s198_s5 = int_to_ptr.hbm [resolvable:$true] %s197_s5 }
  0x18   : > { %1098 = dma.hbm_to_vmem [thread:$0]  (!%p1494_p10), %s184_s10, 4096, %s186_s14, [#allocation6], %s1397_s21, %s1397_s21, %s1398_s22  }
  0x19   : > { %s1399_s8 = smov [#allocation8]   ;;  %s43_s29 = sadd.s32 1, %s1379_s17 }
  0x1a   : > { %s199_s9 = sshll.u32 %s1399_s8, 4  ;;  %s34_s6 = sadd.s32 1, %s1387_s19  ;;  %s200_s9 = int_to_ptr.vmem [resolvable:$true] %s199_s9 }
  0x1b   : > { %1101 = dma.hbm_to_vmem [thread:$0]  (!%p1494_p10), %s198_s5, 2048, %s200_s9, [#allocation9], %s1397_s21, %s1397_s21, %s1398_s22  }
  0x1c   : > { %p50_p12 = scmp.ne.s32.totalorder %s1379_s17, %s1375_s16  ;;  %p36_p13 = scmp.ge.s32.totalorder %s34_s6, 2 }
  0x1d   : > { %p51_p0 = scmp.eq.s32.totalorder %s1391_s20, 0  ;;  %p1113_p5 = scmp.lt.s32.totalorder %s1391_s20, 2 }
  0x1e   : > { %p1518_p3 = por %p1467_p2, %p50_p12  ;;  %s1657_s6 = smov (%p36_p13, %s34_s6), 0 }
  0x1f   : > { %p52_p7 = por %p51_p0, %p50_p12  ;;  %s213_s11 = sand.u32 1, %s1379_s17  }
  0x20   : > { %s38_s12 = ssub.s32 %s1387_s19, %s1657_s6  ;;  %s1073_s7 = smul.u32 48, %s213_s11 }
  0x21   : > { %p41_p9 = scmp.eq.s32.totalorder %s38_s12, 0  ;;  %s1074_s13 = smul.u32 48, %s1387_s19 }
  0x22   : > { %p1103_p10 = pnand %p1113_p5, %p52_p7  ;;  %s217_s28 = scalar_lea.vmem [#allocation2], %s1073_s7 }
  0x23   : > { %s1530_s14 = scalar_select %p41_p9, %s1379_s17, %s43_s29  }
  0x24   : > { %s225_s24 = scalar_lea.hbm %s1637_s0, %s1074_s13  ;;  %s228_s5 = sshll.u32 %s217_s28, 4  ;;  %s229_s5 = int_to_ptr.vmem [resolvable:$true] %s228_s5 }
  0x25   : > { %s226_s27 = sshll.u32 %s225_s24, 4  ;;  %s214_s8 = scalar_lea.sflag [#allocation3], %s213_s11  ;;  %s227_s27 = int_to_ptr.hbm [resolvable:$true] %s226_s27 }
  0x26   : > { %s1400_s9 = smov 384   ;;  %s1401_s1 = smov 24  }
  0x27   : > { %1105 = dma.hbm_to_vmem [thread:$0]  (!%p1103_p10), %s227_s27, 768, %s229_s5, %s214_s8, %s1400_s9, %s1400_s9, %s1401_s1  }
  0x28   : > { %240 = sbr.rel (%p1486_p8) target bundleno = 592 (0x250), region = 36  ;;  %s1538_s29 = sand.u32 (!%p1486_p8), 1, %s1375_s16  }
  0x29   : > { %s1075_s12 = smul.u32 (!%p1486_p8), 48, %s1538_s29  ;;  %s243_s13 = scalar_lea.sflag (!%p1486_p8), [#allocation3], %s1538_s29 }
  0x2b   : > { %s1542_s21 = scalar_lea.vmem (!%p1486_p8), [#allocation2], %s1075_s12 }
  0x2d   : > { %1354 = dma.done.wait (%p1473_p4), %s243_s13, 768  }
  0x2e   : > { %1356 = vsyncadd (%p1473_p4), %s243_s13, 4294966528 }
  0x2f   : > { %1358 = dma.done.wait (%p1463_p1), [#allocation6], 28672  }
  0x30   : > { %1360 = vsyncadd (%p1463_p1), [#allocation6], 4294938624 }
  0x31   : > { %1362 = dma.done.wait (%p1463_p1), [#allocation9], 2048  }
  0x32   : > { %1364 = vsyncadd (%p1463_p1), [#allocation9], 4294965248  ;;  %v355_v0 = vld [vmem:[#allocation5 + $0x1e0] sm:$0xff]  ;;  %v356_v4 = vld [vmem:[#allocation5 + $0x1e8] sm:$0xff]  ;;  %s1050_s1 = sshll.u32 %s1538_s29, 4  ;;  %s1056_s23 = sshll.u32 %s1383_s18, 4 }
  0x33   : > { %v483_v1 = vld [vmem:[#allocation5 + $0x5e0] sm:$0xff]  ;;  %487 = vmatpush.msra.mxu0 %v355_v0  ;;  %556 = vmatpush.msra.mxu3 %v356_v4  ;;  %v352_v7 = vld [vmem:[#allocation5 + $0x1c8] sm:$0xff]  ;;  %v357_v62 = vld [vmem:[#allocation5 + $0x1f0] sm:$0xff]  ;;  %s918_s11 = scalar_lea.hbm %s1641_s4, %s1056_s23  ;;  %s286_s7 = scalar_lea.vmem [#allocation10], %s1050_s1 }
  0x34   : > { %v351_v2 = vld [vmem:[#allocation5 + $0x1c0] sm:$0xff]  ;;  %533 = vmatpush.msra.mxu2 %v483_v1  ;;  %v348_v9 = vld [vmem:[#allocation5 + $0x1a8] sm:$0xff]  ;;  %s919_s22 = sshll.u32 %s286_s7, 4  ;;  %s921_s24 = sshll.u32 %s918_s11, 4  ;;  %s920_s22 = int_to_ptr.vmem [resolvable:$true] %s919_s22  ;;  %s922_s24 = int_to_ptr.hbm [resolvable:$true] %s921_s24 }
  0x35   : > { %v479_v3 = vld [vmem:[#allocation5 + $0x5c0] sm:$0xff]  ;;  %488 = vmatpush.msra.mxu0 %v351_v2  ;;  %557 = vmatpush.msra.mxu3 %v352_v7  ;;  %v344_v13 = vld [vmem:[#allocation5 + $0x188] sm:$0xff]  ;;  %v353_v2 = vld [vmem:[#allocation5 + $0x1d0] sm:$0xff]  ;;  %s905_s27 = scalar_lea.sflag [#allocation4], %s1538_s29  ;;  %s1315_s28 = sshra.s32 %s922_s24, 4  ;;  %s1316_s28 = int_to_ptr.hbm [resolvable:$true] %s1315_s28 }
  0x36   : > { %v347_v5 = vld [vmem:[#allocation5 + $0x1a0] sm:$0xff]  ;;  %534 = vmatpush.msra.mxu2 %v479_v3  ;;  %v340_v17 = vld [vmem:[#allocation5 + $0x168] sm:$0xff]  ;;  %v421_v3 = vld [vmem:[#allocation5 + $0x3f0] sm:$0xff]  ;;  %s1317_s5 = scalar_lea.hbm %s1316_s28, 16  ;;  %s1321_s9 = scalar_lea.hbm %s1641_s4, 32 }
  0x37   : > { %v475_v6 = vld [vmem:[#allocation5 + $0x5a0] sm:$0xff]  ;;  %489 = vmatpush.msra.mxu0 %v347_v5  ;;  %558 = vmatpush.msra.mxu3 %v348_v9  ;;  %v336_v21 = vld [vmem:[#allocation5 + $0x148] sm:$0xff]  ;;  %v417_v7 = vld [vmem:[#allocation5 + $0x3d0] sm:$0xff]  ;;  %p1318_p1 = scmp.ne.s32.totalorder %s1316_s28, %s1317_s5  ;;  %p1322_p8 = scmp.lt.s32.totalorder %s1316_s28, %s1641_s4 }
  0x38   : > { %v419_v8 = vld [vmem:[#allocation5 + $0x3e0] sm:$0xff]  ;;  %535 = vmatpush.msra.mxu2 %v475_v6  ;;  %v332_v25 = vld [vmem:[#allocation5 + $0x128] sm:$0xff]  ;;  %v349_v6 = vld [vmem:[#allocation5 + $0x1b0] sm:$0xff]  ;;  %p1323_p12 = scmp.lt.s32.totalorder %s1321_s9, %s1317_s5 }
  0x39   : > { %v343_v10 = vld [vmem:[#allocation5 + $0x180] sm:$0xff]  ;;  %510 = vmatpush.msra.mxu1 %v419_v8  ;;  %559 = vmatpush.msra.mxu3 %v344_v13  ;;  %v328_v29 = vld [vmem:[#allocation5 + $0x108] sm:$0xff]  ;;  %p1319_p2 = pnand %p1318_p1, %p1518_p3 }
  0x3a   : > { %v471_v11 = vld [vmem:[#allocation5 + $0x580] sm:$0xff]  ;;  %490 = vmatpush.msra.mxu0 %v343_v10  ;;  %v324_v33 = vld [vmem:[#allocation5 + $0xe8] sm:$0xff]  ;;  %v345_v10 = vld [vmem:[#allocation5 + $0x190] sm:$0xff]  ;;  %p1324_p13 = por %p1323_p12, %p1322_p8 }
  0x3b   : > { %v415_v12 = vld [vmem:[#allocation5 + $0x3c0] sm:$0xff]  ;;  %536 = vmatpush.msra.mxu2 %v471_v11  ;;  %560 = vmatpush.msra.mxu3 %v340_v17  ;;  %v320_v37 = vld [vmem:[#allocation5 + $0xc8] sm:$0xff]  ;;  %v413_v11 = vld [vmem:[#allocation5 + $0x3b0] sm:$0xff]  ;;  %p1320_p4 = pneg %p1319_p2 }
  0x3c   : > { %v411_v14 = vld [vmem:[#allocation5 + $0x3a0] sm:$0xff]  ;;  %511 = vmatpush.msra.mxu1 %v415_v12  ;;  %v316_v41 = vld [vmem:[#allocation5 + $0xa8] sm:$0xff] }
  0x3d   : > { %v339_v15 = vld [vmem:[#allocation5 + $0x160] sm:$0xff]  ;;  %561 = vmatpush.msra.mxu3 %v336_v21  ;;  %v312_v45 = vld [vmem:[#allocation5 + $0x88] sm:$0xff]  ;;  %p1325_p0 = pnand %p1324_p13, %p1320_p4 }
  0x3e   : > { %v467_v16 = vld [vmem:[#allocation5 + $0x560] sm:$0xff]  ;;  %512 = vmatpush.msra.mxu1 %v411_v14  ;;  %491 = vmatpush.msra.mxu0 %v339_v15  ;;  %v308_v49 = vld [vmem:[#allocation5 + $0x68] sm:$0xff]  ;;  %v341_v14 = vld [vmem:[#allocation5 + $0x170] sm:$0xff] }
  0x3f   : > { %v407_v18 = vld [vmem:[#allocation5 + $0x380] sm:$0xff]  ;;  %537 = vmatpush.msra.mxu2 %v467_v16  ;;  %562 = vmatpush.msra.mxu3 %v332_v25  ;;  %v304_v53 = vld [vmem:[#allocation5 + $0x48] sm:$0xff]  ;;  %v409_v15 = vld [vmem:[#allocation5 + $0x390] sm:$0xff] }
  0x40   : > { %v335_v19 = vld [vmem:[#allocation5 + $0x140] sm:$0xff]  ;;  %513 = vmatpush.msra.mxu1 %v407_v18  ;;  %v300_v57 = vld [vmem:[#allocation5 + $0x28] sm:$0xff]  ;;  %v337_v18 = vld [vmem:[#allocation5 + $0x150] sm:$0xff] }
  0x41   : > { %v463_v20 = vld [vmem:[#allocation5 + $0x540] sm:$0xff]  ;;  %492 = vmatpush.msra.mxu0 %v335_v19  ;;  %563 = vmatpush.msra.mxu3 %v328_v29  ;;  %v420_v61 = vld [vmem:[#allocation5 + $0x3e8] sm:$0xff]  ;;  %v405_v19 = vld [vmem:[#allocation5 + $0x370] sm:$0xff] }
  0x42   : > { %v403_v22 = vld [vmem:[#allocation5 + $0x360] sm:$0xff]  ;;  %538 = vmatpush.msra.mxu2 %v463_v20  ;;  %v296_v63 = vld [vmem:[#allocation5 + $0x8] sm:$0xff] }
  0x43   : > { %v331_v23 = vld [vmem:[#allocation5 + $0x120] sm:$0xff]  ;;  %514 = vmatpush.msra.mxu1 %v403_v22  ;;  %564 = vmatpush.msra.mxu3 %v324_v33  ;;  %v416_v1 = vld [vmem:[#allocation5 + $0x3c8] sm:$0xff]  ;;  %v333_v22 = vld [vmem:[#allocation5 + $0x130] sm:$0xff] }
  0x44   : > { %v459_v24 = vld [vmem:[#allocation5 + $0x520] sm:$0xff]  ;;  %493 = vmatpush.msra.mxu0 %v331_v23  ;;  %v412_v5 = vld [vmem:[#allocation5 + $0x3a8] sm:$0xff]  ;;  %v401_v23 = vld [vmem:[#allocation5 + $0x350] sm:$0xff] }
  0x45   : > { %v399_v26 = vld [vmem:[#allocation5 + $0x340] sm:$0xff]  ;;  %539 = vmatpush.msra.mxu2 %v459_v24  ;;  %565 = vmatpush.msra.mxu3 %v320_v37  ;;  %v484_v8 = vld [vmem:[#allocation5 + $0x5e8] sm:$0xff] }
  0x46   : > { %v327_v27 = vld [vmem:[#allocation5 + $0x100] sm:$0xff]  ;;  %515 = vmatpush.msra.mxu1 %v399_v26  ;;  %v408_v9 = vld [vmem:[#allocation5 + $0x388] sm:$0xff]  ;;  %v329_v26 = vld [vmem:[#allocation5 + $0x110] sm:$0xff] }
  0x47   : > { %v455_v28 = vld [vmem:[#allocation5 + $0x500] sm:$0xff]  ;;  %494 = vmatpush.msra.mxu0 %v327_v27  ;;  %566 = vmatpush.msra.mxu3 %v316_v41  ;;  %v480_v12 = vld [vmem:[#allocation5 + $0x5c8] sm:$0xff]  ;;  %v397_v27 = vld [vmem:[#allocation5 + $0x330] sm:$0xff] }
  0x48   : > { %v395_v30 = vld [vmem:[#allocation5 + $0x320] sm:$0xff]  ;;  %540 = vmatpush.msra.mxu2 %v455_v28  ;;  %v404_v13 = vld [vmem:[#allocation5 + $0x368] sm:$0xff] }
  0x49   : > { %v323_v31 = vld [vmem:[#allocation5 + $0xe0] sm:$0xff]  ;;  %516 = vmatpush.msra.mxu1 %v395_v30  ;;  %567 = vmatpush.msra.mxu3 %v312_v45  ;;  %v476_v16 = vld [vmem:[#allocation5 + $0x5a8] sm:$0xff]  ;;  %v325_v30 = vld [vmem:[#allocation5 + $0xf0] sm:$0xff] }
  0x4a   : > { %v451_v32 = vld [vmem:[#allocation5 + $0x4e0] sm:$0xff]  ;;  %495 = vmatpush.msra.mxu0 %v323_v31  ;;  %v400_v17 = vld [vmem:[#allocation5 + $0x348] sm:$0xff]  ;;  %v393_v31 = vld [vmem:[#allocation5 + $0x310] sm:$0xff] }
  0x4b   : > { %v391_v34 = vld [vmem:[#allocation5 + $0x300] sm:$0xff]  ;;  %541 = vmatpush.msra.mxu2 %v451_v32  ;;  %568 = vmatpush.msra.mxu3 %v308_v49  ;;  %v472_v20 = vld [vmem:[#allocation5 + $0x588] sm:$0xff]  ;;  %v377_v49 = vld [vmem:[#allocation5 + $0x290] sm:$0xff] }
  0x4c   : > { %v319_v35 = vld [vmem:[#allocation5 + $0xc0] sm:$0xff]  ;;  %517 = vmatpush.msra.mxu1 %v391_v34  ;;  %v396_v21 = vld [vmem:[#allocation5 + $0x328] sm:$0xff]  ;;  %v321_v34 = vld [vmem:[#allocation5 + $0xd0] sm:$0xff] }
  0x4d   : > { %v447_v36 = vld [vmem:[#allocation5 + $0x4c0] sm:$0xff]  ;;  %496 = vmatpush.msra.mxu0 %v319_v35  ;;  %569 = vmatpush.msra.mxu3 %v304_v53  ;;  %v468_v24 = vld [vmem:[#allocation5 + $0x568] sm:$0xff]  ;;  %v389_v35 = vld [vmem:[#allocation5 + $0x2f0] sm:$0xff] }
  0x4e   : > { %v387_v38 = vld [vmem:[#allocation5 + $0x2e0] sm:$0xff]  ;;  %542 = vmatpush.msra.mxu2 %v447_v36  ;;  %v392_v25 = vld [vmem:[#allocation5 + $0x308] sm:$0xff]  ;;  %v373_v53 = vld [vmem:[#allocation5 + $0x270] sm:$0xff] }
  0x4f   : > { %v315_v39 = vld [vmem:[#allocation5 + $0xa0] sm:$0xff]  ;;  %518 = vmatpush.msra.mxu1 %v387_v38  ;;  %570 = vmatpush.msra.mxu3 %v300_v57  ;;  %v464_v28 = vld [vmem:[#allocation5 + $0x548] sm:$0xff]  ;;  %v317_v38 = vld [vmem:[#allocation5 + $0xb0] sm:$0xff] }
  0x50   : > { %v443_v40 = vld [vmem:[#allocation5 + $0x4a0] sm:$0xff]  ;;  %497 = vmatpush.msra.mxu0 %v315_v39  ;;  %v388_v29 = vld [vmem:[#allocation5 + $0x2e8] sm:$0xff]  ;;  %v385_v39 = vld [vmem:[#allocation5 + $0x2d0] sm:$0xff] }
  0x51   : > { %v383_v42 = vld [vmem:[#allocation5 + $0x2c0] sm:$0xff]  ;;  %543 = vmatpush.msra.mxu2 %v443_v40  ;;  %571 = vmatpush.msra.mxu3 %v296_v63  ;;  %v460_v32 = vld [vmem:[#allocation5 + $0x528] sm:$0xff]  ;;  %v301_v57 = vld [vmem:[#allocation5 + $0x30] sm:$0xff] }
  0x52   : > { %v311_v43 = vld [vmem:[#allocation5 + $0x80] sm:$0xff]  ;;  %519 = vmatpush.msra.mxu1 %v383_v42  ;;  %v384_v33 = vld [vmem:[#allocation5 + $0x2c8] sm:$0xff]  ;;  %v365_v63 = vld [vmem:[#allocation5 + $0x230] sm:$0xff] }
  0x53   : > { %v439_v44 = vld [vmem:[#allocation5 + $0x480] sm:$0xff]  ;;  %498 = vmatpush.msra.mxu0 %v311_v43  ;;  %648 = vmatpush.msrb.mxu3 %v421_v3  ;;  %v456_v36 = vld [vmem:[#allocation5 + $0x508] sm:$0xff]  ;;  %v313_v43 = vld [vmem:[#allocation5 + $0x90] sm:$0xff] }
  0x54   : > { %v379_v46 = vld [vmem:[#allocation5 + $0x2a0] sm:$0xff]  ;;  %544 = vmatpush.msra.mxu2 %v439_v44  ;;  %v380_v37 = vld [vmem:[#allocation5 + $0x2a8] sm:$0xff]  ;;  %v381_v44 = vld [vmem:[#allocation5 + $0x2b0] sm:$0xff] }
  0x55   : > { %v307_v47 = vld [vmem:[#allocation5 + $0x60] sm:$0xff]  ;;  %520 = vmatpush.msra.mxu1 %v379_v46  ;;  %649 = vmatpush.msrb.mxu3 %v417_v7  ;;  %v376_v41 = vld [vmem:[#allocation5 + $0x288] sm:$0xff]  ;;  %v361_v3 = vld [vmem:[#allocation5 + $0x210] sm:$0xff] }
  0x56   : > { %v435_v48 = vld [vmem:[#allocation5 + $0x460] sm:$0xff]  ;;  %499 = vmatpush.msra.mxu0 %v307_v47  ;;  %v452_v42 = vld [vmem:[#allocation5 + $0x4e8] sm:$0xff]  ;;  %v486_v7 = vld [vmem:[#allocation5 + $0x5f8] sm:$0xff] }
  0x57   : > { %v375_v50 = vld [vmem:[#allocation5 + $0x280] sm:$0xff]  ;;  %545 = vmatpush.msra.mxu2 %v435_v48  ;;  %650 = vmatpush.msrb.mxu3 %v413_v11  ;;  %v1561_v45 = vld [vmem:[%s1542_s21 + $0x8] sm:$0xff]  ;;  %v309_v48 = vld [vmem:[#allocation5 + $0x70] sm:$0xff] }
  0x58   : > { %v303_v51 = vld [vmem:[#allocation5 + $0x40] sm:$0xff]  ;;  %521 = vmatpush.msra.mxu1 %v375_v50  ;;  %v372_v46 = vld [vmem:[#allocation5 + $0x268] sm:$0xff]  ;;  %v482_v11 = vld [vmem:[#allocation5 + $0x5d8] sm:$0xff] }
  0x59   : > { %v431_v52 = vld [vmem:[#allocation5 + $0x440] sm:$0xff]  ;;  %500 = vmatpush.msra.mxu0 %v303_v51  ;;  %651 = vmatpush.msrb.mxu3 %v409_v15  ;;  %v448_v47 = vld [vmem:[#allocation5 + $0x4c8] sm:$0xff]  ;;  %v358_v15 = vld [vmem:[#allocation5 + $0x1f8] sm:$0xff] }
  0x5a   : > { %v371_v54 = vld [vmem:[#allocation5 + $0x260] sm:$0xff]  ;;  %546 = vmatpush.msra.mxu2 %v431_v52  ;;  %v368_v50 = vld [vmem:[#allocation5 + $0x248] sm:$0xff]  ;;  %v305_v52 = vld [vmem:[#allocation5 + $0x50] sm:$0xff] }
  0x5b   : > { %v299_v55 = vld [vmem:[#allocation5 + $0x20] sm:$0xff]  ;;  %522 = vmatpush.msra.mxu1 %v371_v54  ;;  %652 = vmatpush.msrb.mxu3 %v405_v19  ;;  %v444_v51 = vld [vmem:[#allocation5 + $0x4a8] sm:$0xff]  ;;  %v354_v19 = vld [vmem:[#allocation5 + $0x1d8] sm:$0xff] }
  0x5c   : > { %v427_v56 = vld [vmem:[#allocation5 + $0x420] sm:$0xff]  ;;  %501 = vmatpush.msra.mxu0 %v299_v55  ;;  %v364_v55 = vld [vmem:[#allocation5 + $0x228] sm:$0xff] }
  0x5d   : > { %v367_v58 = vld [vmem:[#allocation5 + $0x240] sm:$0xff]  ;;  %547 = vmatpush.msra.mxu2 %v427_v56  ;;  %653 = vmatpush.msrb.mxu3 %v401_v23  ;;  %v440_v56 = vld [vmem:[#allocation5 + $0x488] sm:$0xff]  ;;  %v350_v23 = vld [vmem:[#allocation5 + $0x1b8] sm:$0xff] }
  0x5e   : > { %v295_v59 = vld [vmem:[#allocation5] sm:$0xff]  ;;  %523 = vmatpush.msra.mxu1 %v367_v58  ;;  %v369_v58 = vld [vmem:[#allocation5 + $0x250] sm:$0xff] }
  0x5f   : > { %v423_v60 = vld [vmem:[#allocation5 + $0x400] sm:$0xff]  ;;  %502 = vmatpush.msra.mxu0 %v295_v59  ;;  %654 = vmatpush.msrb.mxu3 %v397_v27  ;;  %v1569_v59 = vld [vmem:[%s1542_s21 + $0x18] sm:$0xff] }
  0x60   : > { %v363_v0 = vld [vmem:[#allocation5 + $0x220] sm:$0xff]  ;;  %548 = vmatpush.msra.mxu2 %v423_v60  ;;  %v360_v60 = vld [vmem:[#allocation5 + $0x208] sm:$0xff]  ;;  %v346_v27 = vld [vmem:[#allocation5 + $0x198] sm:$0xff] }
  0x61   : > { %579 = vmatpush.msrb.mxu0 %v420_v61  ;;  %v359_v4 = vld [vmem:[#allocation5 + $0x200] sm:$0xff]  ;;  %524 = vmatpush.msra.mxu1 %v363_v0  ;;  %v436_v61 = vld [vmem:[#allocation5 + $0x468] sm:$0xff]  ;;  %v485_v0 = vld [vmem:[#allocation5 + $0x5f0] sm:$0xff] }
  0x62   : > { %625 = vmatpush.msrb.mxu2 %v357_v62  ;;  %655 = vmatpush.msrb.mxu3 %v393_v31  ;;  %v1557_v40 = vld [vmem:[%s1542_s21] sm:$0xff]  ;;  %v1565_v54 = vld [vmem:[%s1542_s21 + $0x10] sm:$0xff]  ;;  %v342_v31 = vld [vmem:[#allocation5 + $0x178] sm:$0xff] }
  0x63   : > { %580 = vmatpush.msrb.mxu0 %v416_v1  ;;  %525 = vmatpush.msra.mxu1 %v359_v4  ;;  %v297_v62 = vld [vmem:[#allocation5 + $0x10] sm:$0xff]  ;;  %v422_v1 = vld [vmem:[#allocation5 + $0x3f8] sm:$0xff]  ;;  %v432_v4 = vld [vmem:[#allocation5 + $0x448] sm:$0xff] }
  0x64   : > { %626 = vmatpush.msrb.mxu2 %v353_v2  ;;  %656 = vmatpush.msrb.mxu3 %v389_v35  ;;  %v1574_v2 = vld [vmem:[%s1542_s21 + $0x20] sm:$0xff]  ;;  %v338_v35 = vld [vmem:[#allocation5 + $0x158] sm:$0xff] }
  0x65   : > { %581 = vmatpush.msrb.mxu0 %v412_v5  ;;  %602 = vmatpush.msrb.mxu1 %v484_v8  ;;  %v481_v5 = vld [vmem:[#allocation5 + $0x5d0] sm:$0xff]  ;;  %v428_v8 = vld [vmem:[#allocation5 + $0x428] sm:$0xff] }
  0x66   : > { %627 = vmatpush.msrb.mxu2 %v349_v6  ;;  %657 = vmatpush.msrb.mxu3 %v385_v39  ;;  %v418_v6 = vld [vmem:[#allocation5 + $0x3d8] sm:$0xff] }
  0x67   : > { %582 = vmatpush.msrb.mxu0 %v408_v9  ;;  %603 = vmatpush.msrb.mxu1 %v480_v12  ;;  %v477_v9 = vld [vmem:[#allocation5 + $0x5b0] sm:$0xff]  ;;  %v1578_v12 = vld [vmem:[%s1542_s21 + $0x28] sm:$0xff] }
  0x68   : > { %628 = vmatpush.msrb.mxu2 %v345_v10  ;;  %503 = vmatmul.f32.vlgmr.msra.gmra.mxu0 %v1557_v40  ;;  %v414_v10 = vld [vmem:[#allocation5 + $0x3b8] sm:$0xff] }
  0x69   : > { %583 = vmatpush.msrb.mxu0 %v404_v13  ;;  %604 = vmatpush.msrb.mxu1 %v476_v16  ;;  %v424_v13 = vld [vmem:[#allocation5 + $0x408] sm:$0xff]  ;;  %v410_v16 = vld [vmem:[#allocation5 + $0x398] sm:$0xff] }
  0x6a   : > { %629 = vmatpush.msrb.mxu2 %v341_v14  ;;  %658 = vmatpush.msrb.mxu3 %v381_v44  ;;  %v473_v14 = vld [vmem:[#allocation5 + $0x590] sm:$0xff]  ;;  %v334_v39 = vld [vmem:[#allocation5 + $0x138] sm:$0xff] }
  0x6b   : > { %584 = vmatpush.msrb.mxu0 %v400_v17  ;;  %605 = vmatpush.msrb.mxu1 %v472_v20  ;;  %v478_v17 = vld [vmem:[#allocation5 + $0x5b8] sm:$0xff] }
  0x6c   : > { %630 = vmatpush.msrb.mxu2 %v337_v18  ;;  %526 = vmatmul.f32.vlgmr.msra.gmra.mxu1 %v1561_v45  ;;  %v469_v18 = vld [vmem:[#allocation5 + $0x570] sm:$0xff]  ;;  %v406_v20 = vld [vmem:[#allocation5 + $0x378] sm:$0xff] }
  0x6d   : > { %585 = vmatpush.msrb.mxu0 %v396_v21  ;;  %606 = vmatpush.msrb.mxu1 %v468_v24  ;;  %v474_v21 = vld [vmem:[#allocation5 + $0x598] sm:$0xff] }
  0x6e   : > { %631 = vmatpush.msrb.mxu2 %v333_v22  ;;  %659 = vmatpush.msrb.mxu3 %v377_v49  ;;  %v465_v22 = vld [vmem:[#allocation5 + $0x550] sm:$0xff]  ;;  %v402_v24 = vld [vmem:[#allocation5 + $0x358] sm:$0xff] }
  0x6f   : > { %586 = vmatpush.msrb.mxu0 %v392_v25  ;;  %607 = vmatpush.msrb.mxu1 %v464_v28  ;;  %v470_v25 = vld [vmem:[#allocation5 + $0x578] sm:$0xff] }
  0x70   : > { %632 = vmatpush.msrb.mxu2 %v329_v26  ;;  %660 = vmatpush.msrb.mxu3 %v373_v53  ;;  %v461_v26 = vld [vmem:[#allocation5 + $0x530] sm:$0xff]  ;;  %v398_v28 = vld [vmem:[#allocation5 + $0x338] sm:$0xff] }
  0x71   : > { %587 = vmatpush.msrb.mxu0 %v388_v29  ;;  %608 = vmatpush.msrb.mxu1 %v460_v32  ;;  %v466_v29 = vld [vmem:[#allocation5 + $0x558] sm:$0xff] }
  0x72   : > { %633 = vmatpush.msrb.mxu2 %v325_v30  ;;  %661 = vmatpush.msrb.mxu3 %v369_v58  ;;  %v457_v30 = vld [vmem:[#allocation5 + $0x510] sm:$0xff]  ;;  %v394_v32 = vld [vmem:[#allocation5 + $0x318] sm:$0xff] }
  0x73   : > { %588 = vmatpush.msrb.mxu0 %v384_v33  ;;  %609 = vmatpush.msrb.mxu1 %v456_v36  ;;  %v462_v33 = vld [vmem:[#allocation5 + $0x538] sm:$0xff] }
  0x74   : > { %634 = vmatpush.msrb.mxu2 %v321_v34  ;;  %506 = vmatmul.f32.gmra.mxu0 %v1569_v59  ;;  %v453_v34 = vld [vmem:[#allocation5 + $0x4f0] sm:$0xff]  ;;  %v390_v36 = vld [vmem:[#allocation5 + $0x2f8] sm:$0xff] }
  0x75   : > { %589 = vmatpush.msrb.mxu0 %v380_v37  ;;  %610 = vmatpush.msrb.mxu1 %v452_v42  ;;  %v458_v37 = vld [vmem:[#allocation5 + $0x518] sm:$0xff] }
  0x76   : > { %635 = vmatpush.msrb.mxu2 %v317_v38  ;;  %572 = vmatmul.f32.vlgmr.msra.gmra.mxu3 %v1557_v40  ;;  %v449_v38 = vld [vmem:[#allocation5 + $0x4d0] sm:$0xff]  ;;  %v454_v42 = vld [vmem:[#allocation5 + $0x4f8] sm:$0xff] }
  0x77   : > { %590 = vmatpush.msrb.mxu0 %v376_v41  ;;  %611 = vmatpush.msrb.mxu1 %v448_v47  ;;  %v386_v41 = vld [vmem:[#allocation5 + $0x2d8] sm:$0xff] }
  0x78   : > { %636 = vmatpush.msrb.mxu2 %v313_v43  ;;  %662 = vmatpush.msrb.mxu3 %v365_v63  ;;  %v445_v43 = vld [vmem:[#allocation5 + $0x4b0] sm:$0xff]  ;;  %v330_v44 = vld [vmem:[#allocation5 + $0x118] sm:$0xff] }
  0x79   : > { %591 = vmatpush.msrb.mxu0 %v372_v46  ;;  %612 = vmatpush.msrb.mxu1 %v444_v51  ;;  %v382_v46 = vld [vmem:[#allocation5 + $0x2b8] sm:$0xff] }
  0x7a   : > { %637 = vmatpush.msrb.mxu2 %v309_v48  ;;  %529 = vmatmul.f32.gmra.mxu1 %v1574_v2  ;;  %v450_v47 = vld [vmem:[#allocation5 + $0x4d8] sm:$0xff]  ;;  %v441_v48 = vld [vmem:[#allocation5 + $0x490] sm:$0xff] }
  0x7b   : > { %592 = vmatpush.msrb.mxu0 %v368_v50  ;;  %549 = vmatmul.f32.vlgmr.msra.gmra.mxu2 %v1565_v54  ;;  %v326_v49 = vld [vmem:[#allocation5 + $0xf8] sm:$0xff] }
  0x7c   : > { %638 = vmatpush.msrb.mxu2 %v305_v52  ;;  %613 = vmatpush.msrb.mxu1 %v440_v56  ;;  %v378_v50 = vld [vmem:[#allocation5 + $0x298] sm:$0xff]  ;;  %v437_v52 = vld [vmem:[#allocation5 + $0x470] sm:$0xff] }
  0x7d   : > { %593 = vmatpush.msrb.mxu0 %v364_v55  ;;  %663 = vmatpush.msrb.mxu3 %v361_v3  ;;  %v446_v51 = vld [vmem:[#allocation5 + $0x4b8] sm:$0xff]  ;;  %v425_v3 = vld [vmem:[#allocation5 + $0x410] sm:$0xff] }
  0x7e   : > { %639 = vmatpush.msrb.mxu2 %v301_v57  ;;  %614 = vmatpush.msrb.mxu1 %v436_v61  ;;  %v322_v53 = vld [vmem:[#allocation5 + $0xd8] sm:$0xff]  ;;  %v433_v57 = vld [vmem:[#allocation5 + $0x450] sm:$0xff] }
  0x7f   : > { %594 = vmatpush.msrb.mxu0 %v360_v60  ;;  %740 = vmatpush.msra.mxu3 %v486_v7  ;;  %v374_v55 = vld [vmem:[#allocation5 + $0x278] sm:$0xff] }
  0x80   : > { %640 = vmatpush.msrb.mxu2 %v297_v62  ;;  %615 = vmatpush.msrb.mxu1 %v432_v4  ;;  %v442_v56 = vld [vmem:[#allocation5 + $0x498] sm:$0xff]  ;;  %v429_v62 = vld [vmem:[#allocation5 + $0x430] sm:$0xff] }
  0x81   : > { %671 = vmatpush.msra.mxu0 %v485_v0  ;;  %741 = vmatpush.msra.mxu3 %v482_v11  ;;  %v318_v58 = vld [vmem:[#allocation5 + $0xb8] sm:$0xff] }
  0x82   : > { %717 = vmatpush.msra.mxu2 %v422_v1  ;;  %616 = vmatpush.msrb.mxu1 %v428_v8  ;;  %v370_v60 = vld [vmem:[#allocation5 + $0x258] sm:$0xff] }
  0x83   : > { %672 = vmatpush.msra.mxu0 %v481_v5  ;;  %552 = vmatmul.f32.gmra.mxu2 %v1578_v12  ;;  %v438_v61 = vld [vmem:[#allocation5 + $0x478] sm:$0xff] }
  0x84   : > { %718 = vmatpush.msra.mxu2 %v418_v6  ;;  %617 = vmatpush.msrb.mxu1 %v424_v13  ;;  %v314_v63 = vld [vmem:[#allocation5 + $0x98] sm:$0xff]  ;;  %v788_v13 = vld [vmem:[#allocation7 + $0x68] sm:$0xff] }
  0x85   : > { %673 = vmatpush.msra.mxu0 %v477_v9  ;;  %742 = vmatpush.msra.mxu3 %v478_v17  ;;  %v366_v0 = vld [vmem:[#allocation5 + $0x238] sm:$0xff]  ;;  %v803_v17 = vld [vmem:[#allocation7 + $0xe0] sm:$0xff] }
  0x86   : > { %719 = vmatpush.msra.mxu2 %v414_v10  ;;  %694 = vmatpush.msra.mxu1 %v358_v15  ;;  %v434_v1 = vld [vmem:[#allocation5 + $0x458] sm:$0xff]  ;;  %v804_v15 = vld [vmem:[#allocation7 + $0xe8] sm:$0xff] }
  0x87   : > { %674 = vmatpush.msra.mxu0 %v473_v14  ;;  %575 = vmatmul.f32.gmra.mxu3 %v1569_v59  ;;  %v310_v4 = vld [vmem:[#allocation5 + $0x78] sm:$0xff] }
  0x88   : > { %720 = vmatpush.msra.mxu2 %v410_v16  ;;  %595 = vmatmul.f32.vlgmr.msrb.gmra.mxu0 %v1561_v45  ;;  %v362_v5 = vld [vmem:[#allocation5 + $0x218] sm:$0xff]  ;;  %v783_v16 = vld [vmem:[#allocation7 + $0x40] sm:$0xff] }
  0x89   : > { %675 = vmatpush.msra.mxu0 %v469_v18  ;;  %695 = vmatpush.msra.mxu1 %v354_v19  ;;  %v430_v6 = vld [vmem:[#allocation5 + $0x438] sm:$0xff] }
  0x8a   : > { %721 = vmatpush.msra.mxu2 %v406_v20  ;;  %743 = vmatpush.msra.mxu3 %v474_v21  ;;  %v306_v7 = vld [vmem:[#allocation5 + $0x58] sm:$0xff]  ;;  %v781_v20 = vld [vmem:[#allocation7 + $0x30] sm:$0xff] }
  0x8b   : > { %618 = vmatmul.f32.vlgmr.msrb.gmra.mxu1 %v1565_v54  ;;  %676 = vmatpush.msra.mxu0 %v465_v22  ;;  %v426_v8 = vld [vmem:[#allocation5 + $0x418] sm:$0xff]  ;;  %v801_v21 = vld [vmem:[#allocation7 + $0xd0] sm:$0xff] }
  0x8c   : > { %696 = vmatpush.msra.mxu1 %v350_v23  ;;  %722 = vmatpush.msra.mxu2 %v402_v24  ;;  %v302_v9 = vld [vmem:[#allocation5 + $0x38] sm:$0xff]  ;;  %v780_v23 = vld [vmem:[#allocation7 + $0x28] sm:$0xff] }
  0x8d   : > { %744 = vmatpush.msra.mxu3 %v470_v25  ;;  %677 = vmatpush.msra.mxu0 %v461_v26  ;;  %v298_v10 = vld [vmem:[#allocation5 + $0x18] sm:$0xff]  ;;  %v800_v24 = vld [vmem:[#allocation7 + $0xc8] sm:$0xff]  ;;  %v779_v25 = vld [vmem:[#allocation7 + $0x20] sm:$0xff] }
  0x8e   : > { %697 = vmatpush.msra.mxu1 %v346_v27  ;;  %723 = vmatpush.msra.mxu2 %v398_v28  ;;  %v790_v11 = vld [vmem:[#allocation7 + $0x78] sm:$0xff]  ;;  %v799_v26 = vld [vmem:[#allocation7 + $0xc0] sm:$0xff] }
  0x8f   : > { %745 = vmatpush.msra.mxu3 %v466_v29  ;;  %678 = vmatpush.msra.mxu0 %v457_v30  ;;  %v786_v14 = vld [vmem:[#allocation7 + $0x58] sm:$0xff] }
  0x90   : > { %698 = vmatpush.msra.mxu1 %v342_v31  ;;  %724 = vmatpush.msra.mxu2 %v394_v32  ;;  %v782_v18 = vld [vmem:[#allocation7 + $0x38] sm:$0xff]  ;;  %v777_v31 = vld [vmem:[#allocation7 + $0x10] sm:$0xff] }
  0x91   : > { %746 = vmatpush.msra.mxu3 %v462_v33  ;;  %598 = vmatmul.f32.gmra.mxu0 %v1574_v2  ;;  %v802_v19 = vld [vmem:[#allocation7 + $0xd8] sm:$0xff]  ;;  %v797_v32 = vld [vmem:[#allocation7 + $0xb0] sm:$0xff] }
  0x92   : > { %641 = vmatmul.f32.vlgmr.msrb.gmra.mxu2 %v1557_v40  ;;  %664 = vmatmul.f32.vlgmr.msrb.gmra.mxu3 %v1561_v45  ;;  %v778_v28 = vld [vmem:[#allocation7 + $0x18] sm:$0xff] }
  0x93   : > { %679 = vmatpush.msra.mxu0 %v453_v34  ;;  %699 = vmatpush.msra.mxu1 %v338_v35  ;;  %v798_v29 = vld [vmem:[#allocation7 + $0xb8] sm:$0xff]  ;;  %v776_v35 = vld [vmem:[#allocation7 + $0x8] sm:$0xff] }
  0x94   : > { %725 = vmatpush.msra.mxu2 %v390_v36  ;;  %747 = vmatpush.msra.mxu3 %v458_v37  ;;  %v796_v36 = vld [vmem:[#allocation7 + $0xa8] sm:$0xff]  ;;  %v775_v37 = vld [vmem:[#allocation7] sm:$0xff] }
  0x95   : > { %621 = vmatmul.f32.gmra.mxu1 %v1578_v12  ;;  %680 = vmatpush.msra.mxu0 %v449_v38  ;;  %v795_v38 = vld [vmem:[#allocation7 + $0xa0] sm:$0xff] }
  0x96   : > { %700 = vmatpush.msra.mxu1 %v334_v39  ;;  %726 = vmatpush.msra.mxu2 %v386_v41  ;;  %v794_v39 = vld [vmem:[#allocation7 + $0x98] sm:$0xff] }
  0x97   : > { %748 = vmatpush.msra.mxu3 %v454_v42  ;;  %681 = vmatpush.msra.mxu0 %v445_v43  ;;  %v793_v42 = vld [vmem:[#allocation7 + $0x90] sm:$0xff] }
  0x98   : > { %701 = vmatpush.msra.mxu1 %v330_v44  ;;  %727 = vmatpush.msra.mxu2 %v382_v46  ;;  %v792_v44 = vld [vmem:[#allocation7 + $0x88] sm:$0xff] }
  0x99   : > { %749 = vmatpush.msra.mxu3 %v450_v47  ;;  %682 = vmatpush.msra.mxu0 %v441_v48  ;;  %v791_v48 = vld [vmem:[#allocation7 + $0x80] sm:$0xff] }
  0x9a   : > { %702 = vmatpush.msra.mxu1 %v326_v49  ;;  %728 = vmatpush.msra.mxu2 %v378_v50 }
  0x9b   : > { %750 = vmatpush.msra.mxu3 %v446_v51  ;;  %644 = vmatmul.f32.gmra.mxu2 %v1569_v59 }
  0x9c   : > { %667 = vmatmul.f32.gmra.mxu3 %v1574_v2  ;;  %683 = vmatpush.msra.mxu0 %v437_v52 }
  0x9d   : > { %703 = vmatpush.msra.mxu1 %v322_v53  ;;  %729 = vmatpush.msra.mxu2 %v374_v55  ;;  %v878_v53 = vld [vmem:[#allocation8 + $0x78] sm:$0xff]  ;;  %v877_v55 = vld [vmem:[#allocation8 + $0x70] sm:$0xff] }
  0x9e   : > { %751 = vmatpush.msra.mxu3 %v442_v56  ;;  %684 = vmatpush.msra.mxu0 %v433_v57  ;;  %v876_v56 = vld [vmem:[#allocation8 + $0x68] sm:$0xff] }
  0x9f   : > { %704 = vmatpush.msra.mxu1 %v318_v58  ;;  %730 = vmatpush.msra.mxu2 %v370_v60 }
  0xa0   : > { %752 = vmatpush.msra.mxu3 %v438_v61  ;;  %685 = vmatpush.msra.mxu0 %v429_v62 }
  0xa1   : > { %705 = vmatpush.msra.mxu1 %v314_v63  ;;  %731 = vmatpush.msra.mxu2 %v366_v0 }
  0xa2   : > { %753 = vmatpush.msra.mxu3 %v434_v1  ;;  %686 = vmatpush.msra.mxu0 %v425_v3 }
  0xa3   : > { %706 = vmatpush.msra.mxu1 %v310_v4  ;;  %732 = vmatpush.msra.mxu2 %v362_v5 }
  0xa4   : > { %754 = vmatpush.msra.mxu3 %v430_v6  ;;  %687 = vmatmul.f32.vlgmr.msra.gmra.mxu0 %v1565_v54 }
  0xa5   : > { %733 = vmatmul.f32.vlgmr.msra.gmra.mxu2 %v1561_v45  ;;  %707 = vmatpush.msra.mxu1 %v306_v7  ;;  %v789_v45 = vld [vmem:[#allocation7 + $0x70] sm:$0xff] }
  0xa6   : > { %755 = vmatpush.msra.mxu3 %v426_v8  ;;  %807 = vmatpush.msrb.mxu0 %v790_v11 }
  0xa7   : > { %756 = vmatmul.f32.vlgmr.msra.gmra.mxu3 %v1565_v54  ;;  %708 = vmatpush.msra.mxu1 %v302_v9  ;;  %v787_v54 = vld [vmem:[#allocation7 + $0x60] sm:$0xff] }
  0xa8   : > { %1057 = vmatpush.msrb.mxu3 %v790_v11  ;;  %808 = vmatpush.msrb.mxu0 %v789_v45 }
  0xa9   : > { %709 = vmatpush.msra.mxu1 %v298_v10  ;;  %879 = vmatpush.msrb.mxu2 %v878_v53 }
  0xaa   : > { %710 = vmatmul.f32.vlgmr.msra.gmra.mxu1 %v1557_v40  ;;  %1058 = vmatpush.msrb.mxu3 %v789_v45  ;;  %v806_v40 = vld [vmem:[#allocation7 + $0xf8] sm:$0xff] }
  0xab   : > { %809 = vmatpush.msrb.mxu0 %v788_v13  ;;  %830 = vmatpush.msrb.mxu1 %v806_v40 }
  0xac   : > { %690 = vmatmul.f32.gmra.mxu0 %v1578_v12  ;;  %1059 = vmatpush.msrb.mxu3 %v788_v13 }
  0xad   : > { %736 = vmatmul.f32.gmra.mxu2 %v1574_v2  ;;  %810 = vmatpush.msrb.mxu0 %v787_v54  ;;  %v785_v2 = vld [vmem:[#allocation7 + $0x50] sm:$0xff] }
  0xae   : > { %1060 = vmatpush.msrb.mxu3 %v787_v54  ;;  %880 = vmatpush.msrb.mxu2 %v877_v55 }
  0xaf   : > { %759 = vmatmul.f32.gmra.mxu3 %v1578_v12  ;;  %811 = vmatpush.msrb.mxu0 %v786_v14  ;;  %v805_v12 = vld [vmem:[#allocation7 + $0xf0] sm:$0xff] }
  0xb0   : > { %1061 = vmatpush.msrb.mxu3 %v786_v14  ;;  %831 = vmatpush.msrb.mxu1 %v805_v12 }
  0xb1   : > { %812 = vmatpush.msrb.mxu0 %v785_v2  ;;  %881 = vmatpush.msrb.mxu2 %v876_v56 }
  0xb2   : > { %713 = vmatmul.f32.gmra.mxu1 %v1569_v59  ;;  %v784_v59 = vld [vmem:[#allocation7 + $0x48] sm:$0xff]  ;;  %1062 = vmatpush.msrb.mxu3 %v785_v2 }
  0xb3   : > { %813 = vmatpush.msrb.mxu0 %v784_v59  ;;  %832 = vmatpush.msrb.mxu1 %v804_v15 }
  0xb4   : > { %1063 = vmatpush.msrb.mxu3 %v784_v59 }
  0xb5   : > { %814 = vmatpush.msrb.mxu0 %v783_v16  ;;  %833 = vmatpush.msrb.mxu1 %v803_v17 }
  0xb6   : > { %1064 = vmatpush.msrb.mxu3 %v783_v16 }
  0xb7   : > { %815 = vmatpush.msrb.mxu0 %v782_v18  ;;  %834 = vmatpush.msrb.mxu1 %v802_v19 }
  0xb8   : > { %1065 = vmatpush.msrb.mxu3 %v782_v18 }
  0xb9   : > { %816 = vmatpush.msrb.mxu0 %v781_v20  ;;  %835 = vmatpush.msrb.mxu1 %v801_v21 }
  0xba   : > { %1066 = vmatpush.msrb.mxu3 %v781_v20 }
  0xbb   : > { %817 = vmatpush.msrb.mxu0 %v780_v23  ;;  %836 = vmatpush.msrb.mxu1 %v800_v24 }
  0xbc   : > { %1067 = vmatpush.msrb.mxu3 %v780_v23 }
  0xbd   : > { %818 = vmatpush.msrb.mxu0 %v779_v25  ;;  %837 = vmatpush.msrb.mxu1 %v799_v26 }
  0xbe   : > { %1068 = vmatpush.msrb.mxu3 %v779_v25 }
  0xbf   : > { %819 = vmatpush.msrb.mxu0 %v778_v28  ;;  %838 = vmatpush.msrb.mxu1 %v798_v29  ;;  %v875_v29 = vld [vmem:[#allocation8 + $0x60] sm:$0xff] }
  0xc0   : > { %1069 = vmatpush.msrb.mxu3 %v778_v28  ;;  %882 = vmatpush.msrb.mxu2 %v875_v29 }
  0xc1   : > { %820 = vmatpush.msrb.mxu0 %v777_v31  ;;  %839 = vmatpush.msrb.mxu1 %v797_v32  ;;  %v872_v32 = vld [vmem:[#allocation8 + $0x48] sm:$0xff] }
  0xc2   : > { %1070 = vmatpush.msrb.mxu3 %v777_v31  ;;  %v873_v31 = vld [vmem:[#allocation8 + $0x50] sm:$0xff] }
  0xc3   : > { %821 = vmatpush.msrb.mxu0 %v776_v35  ;;  %840 = vmatpush.msrb.mxu1 %v796_v36  ;;  %v868_v36 = vld [vmem:[#allocation8 + $0x28] sm:$0xff] }
  0xc4   : > { %1071 = vmatpush.msrb.mxu3 %v776_v35  ;;  %v869_v35 = vld [vmem:[#allocation8 + $0x30] sm:$0xff] }
  0xc5   : > { %822 = vmatpush.msrb.mxu0 %v775_v37  ;;  %841 = vmatpush.msrb.mxu1 %v795_v38  ;;  %v866_v38 = vld [vmem:[#allocation8 + $0x18] sm:$0xff] }
  0xc6   : > { %1072 = vmatpush.msrb.mxu3 %v775_v37  ;;  %v867_v37 = vld [vmem:[#allocation8 + $0x20] sm:$0xff] }
  0xc7   : > { %842 = vmatpush.msrb.mxu1 %v794_v39  ;;  %v865_v39 = vld [vmem:[#allocation8 + $0x10] sm:$0xff] }
  0xc9   : > { %843 = vmatpush.msrb.mxu1 %v793_v42  ;;  %v863_v42 = vld [vmem:[#allocation8] sm:$0xff] }
  0xcb   : > { %844 = vmatpush.msrb.mxu1 %v792_v44 }
  0xcd   : > { %845 = vmatpush.msrb.mxu1 %v791_v48 }
  0xe5   : > { %v504_v22 = vpop.f32.mrf.mxu0 }
  0xe9   : > { %v527_v27 = vpop.f32.mrf.mxu1 }
  0xea   : > { %v528_v57 = vadd.f32 %v527_v27, %v504_v22 }
  0xf1   : > { %v507_v34 = vpop.f32.mrf.mxu0 }
  0xf7   : > { %v530_v41 = vpop.f32.mrf.mxu1 }
  0xf8   : > { %v531_v3 = vadd.f32 %v530_v41, %v507_v34  ;;  %v870_v34 = vld [vmem:[#allocation8 + $0x38] sm:$0xff]  ;;  %v864_v41 = vld [vmem:[#allocation8 + $0x8] sm:$0xff] }
  0xf9   : > { %v573_v33 = vpop.f32.mrf.mxu3 }
  0xfe   : > { %v550_v30 = vpop.f32.mrf.mxu2 }
  0xff   : > { %v551_v61 = vadd.f32 %v550_v30, %v528_v57  ;;  %v874_v30 = vld [vmem:[#allocation8 + $0x58] sm:$0xff] }
 0x100   : > { %883 = vmatpush.msrb.mxu2 %v874_v30 }
 0x101   : > { %v763_v4 = vmul.f32 %v551_v61, %v551_v61 }
 0x102   : > { %884 = vmatpush.msrb.mxu2 %v873_v31 }
 0x104   : > { %885 = vmatpush.msrb.mxu2 %v872_v32 }
 0x105   : > { %v596_v47 = vpop.f32.mrf.mxu0 }
 0x106   : > { %v553_v43 = vpop.f32.mrf.mxu2  ;;  %v597_v6 = vadd.f32 %v596_v47, %v573_v33  ;;  %v871_v33 = vld [vmem:[#allocation8 + $0x40] sm:$0xff] }
 0x107   : > { %v554_v9 = vadd.f32 %v553_v43, %v531_v3  ;;  %886 = vmatpush.msrb.mxu2 %v871_v33 }
 0x108   : > { %v619_v49 = vpop.f32.mrf.mxu1 }
 0x109   : > { %v620_v45 = vadd.f32 %v619_v49, %v597_v6  ;;  %v765_v12 = vmul.f32 %v554_v9, %v554_v9  ;;  %887 = vmatpush.msrb.mxu2 %v870_v34 }
 0x10a   : > { %v576_v46 = vpop.f32.mrf.mxu3 }
 0x10b   : > { %v764_v15 = vmul.f32 %v620_v45, %v620_v45  ;;  %888 = vmatpush.msrb.mxu2 %v869_v35 }
 0x10d   : > { %889 = vmatpush.msrb.mxu2 %v868_v36 }
 0x10e   : > { %v599_v52 = vpop.f32.mrf.mxu0 }
 0x10f   : > { %v600_v16 = vadd.f32 %v599_v52, %v576_v46  ;;  %890 = vmatpush.msrb.mxu2 %v867_v37 }
 0x111   : > { %891 = vmatpush.msrb.mxu2 %v866_v38 }
 0x112   : > { %v622_v60 = vpop.f32.mrf.mxu1 }
 0x113   : > { %v623_v22 = vadd.f32 %v622_v60, %v600_v16  ;;  %892 = vmatpush.msrb.mxu2 %v865_v39 }
 0x115   : > { %v642_v50 = vpop.f32.mrf.mxu2  ;;  %v665_v51 = vpop.f32.mrf.mxu3  ;;  %v766_v26 = vmul.f32 %v623_v22, %v623_v22  ;;  %893 = vmatpush.msrb.mxu2 %v864_v41 }
 0x116   : > { %v666_v62 = vadd.f32 %v665_v51, %v642_v50 }
 0x117   : > { %894 = vmatpush.msrb.mxu2 %v863_v42 }
 0x11e   : > { %v645_v58 = vpop.f32.mrf.mxu2 }
 0x11f   : > { %v668_v0 = vpop.f32.mrf.mxu3 }
 0x120   : > { %v669_v10 = vadd.f32 %v668_v0, %v645_v58 }
 0x121   : > { %v688_v63 = vpop.f32.mrf.mxu0 }
 0x122   : > { %v689_v1 = vadd.f32 %v688_v63, %v666_v62 }
 0x124   : > { %v767_v5 = vmul.f32 %v689_v1, %v689_v1 }
 0x126   : > { %v771_v7 = vadd.f32 %v767_v5, %v763_v4 }
 0x127   : > { %v711_v8 = vpop.f32.mrf.mxu1 }
 0x128   : > { %v734_v11 = vpop.f32.mrf.mxu2  ;;  %823 = vmatmul.f32.vlgmr.msrb.gmra.mxu0 %v771_v7 }
 0x129   : > { %v735_v13 = vadd.f32 %v734_v11, %v711_v8  ;;  %v691_v54 = vpop.f32.mrf.mxu0 }
 0x12a   : > { %v692_v14 = vadd.f32 %v691_v54, %v669_v10  ;;  %v757_v40 = vpop.f32.mrf.mxu3 }
 0x12b   : > { %v758_v2 = vadd.f32 %v757_v40, %v735_v13 }
 0x12c   : > { %v769_v59 = vmul.f32 %v692_v14, %v692_v14 }
 0x12d   : > { %v768_v17 = vmul.f32 %v758_v2, %v758_v2 }
 0x12e   : > { %v773_v18 = vadd.f32 %v769_v59, %v765_v12 }
 0x12f   : > { %v772_v19 = vadd.f32 %v768_v17, %v764_v15  ;;  %v714_v20 = vpop.f32.mrf.mxu1 }
 0x130   : > { %v737_v21 = vpop.f32.mrf.mxu2  ;;  %826 = vmatmul.f32.vlgmr.msrb.gmra.mxu3 %v773_v18 }
 0x131   : > { %v738_v23 = vadd.f32 %v737_v21, %v714_v20  ;;  %846 = vmatmul.f32.vlgmr.msrb.gmra.mxu1 %v772_v19 }
 0x132   : > { %v760_v24 = vpop.f32.mrf.mxu3 }
 0x133   : > { %v761_v25 = vadd.f32 %v760_v24, %v738_v23 }
 0x135   : > { %v770_v27 = vmul.f32 %v761_v25, %v761_v25 }
 0x137   : > { %v774_v28 = vadd.f32 %v770_v27, %v766_v26 }
 0x139   : > { %849 = vmatmul.f32.gmra.mxu1 %v774_v28 }
 0x1a5   : > { %v824_v43 = vpop.f32.mrf.mxu0 }
 0x1ae   : > { %v847_v44 = vpop.f32.mrf.mxu1 }
 0x1af   : > { %v848_v46 = vadd.f32 %v847_v44, %v824_v43 }
 0x1b1   : > { %v853_v47 = vmax.f32 %v848_v46, 1e-10 }
 0x1b3   : > { %1177 = vlog2.f32 %v853_v47  ;;  %v827_v48 = vpop.f32.mrf.mxu3 }
 0x1b6   : > { %v850_v49 = vpop.f32.mrf.mxu1 }
 0x1b7   : > { %v851_v50 = vadd.f32 %v850_v49, %v827_v48 }
 0x1b9   : > { %v1178_v51 = vpop.eup %1177  ;;  %v854_v52 = vmax.f32 %v851_v50, 1e-10 }
 0x1ba   : > { %v856_v53 = vmul.f32 0.6931472, %v1178_v51 }
 0x1bb   : > { %1179 = vlog2.f32 %v854_v52 }
 0x1bc   : > { %v859_v55 = vmul.f32 0.4342945, %v856_v53 }
 0x1be   : > { %v861_v56 = vmul.f32 10.0, %v859_v55 }
 0x1c0   : > { %895 = vmatmul.f32.vlgmr.msrb.gmra.mxu2 %v861_v56 }
 0x1c1   : > { %v1180_v57 = vpop.eup %1179 }
 0x1c2   : > { %v858_v58 = vmul.f32 0.6931472, %v1180_v57 }
 0x1c4   : > { %v860_v60 = vmul.f32 0.4342945, %v858_v58 }
 0x1c6   : > { %v862_v61 = vmul.f32 10.0, %v860_v60 }
 0x1c8   : > { %898 = vmatmul.f32.gmra.mxu2 %v862_v61 }
 0x243   : > { %v896_v62 = vpop.f32.mrf.mxu2 }
 0x244   : > { %902 = vst [vmem:[%s286_s7] sm:$0xff] %v896_v62 }
 0x24b   : > { %v899_v63 = vpop.f32.mrf.mxu2 }
 0x24c   : > { %903 = vst [vmem:[%s286_s7 + $0x8] sm:$0xff] %v899_v63 }
 0x24d   : > { %1328 = shalt.err (!%p1325_p0)
}
 0x24e   : > { %s1402_s29 = smov 128   ;;  %s1403_s21 = smov 8  }
 0x24f   : > { %1090 = dma.vmem_to_hbm [thread:$0]  (%p1518_p3), %s920_s22, 256, %s922_s24, %s905_s27, %s1402_s29, %s1402_s29, %s1403_s21  }
 0x250 PF: > { %s936_s1 = sand.u32 1, %s1371_s15   ;;  %p1107_p5 = pnand %p1044_p11, %p1478_p6 }
 0x251   : > { %s937_s23 = scalar_lea.sflag [#allocation4], %s936_s1 }
 0x252   : > { %p1108_p7 = pneg %p1107_p5 }
 0x254   : > { %1366 = dma.done.wait (%p1108_p7), %s937_s23, 256  }
 0x255   : > { %1368 = vsyncadd (%p1108_p7), %s937_s23, 4294967040  ;;  %s22_s20 = sadd.s32 1, %s1391_s20   ;;  %s1651_s15 = smov %s1375_s16 }
 0x256   : > { %p19_p9 = scmp.ge.s32.totalorder %s22_s20, 4   ;;  %s1652_s16 = smov %s1379_s17 }
 0x257   : > { %s1653_s17 = smov %s1530_s14  ;;  %s1654_s18 = smov %s1387_s19 }
 0x258   : > { %s1655_s19 = smov %s1657_s6  ;;  %21 = sbr.rel (!%p19_p9) target bundleno = 10 (0xa), region = 93 }
 0x25d   :  { %943 = vsyncpa [#allocation3], 1 }
 0x25e   :  { %945 = vsyncpa [#allocation3 + $0x1], 1 }
 0x25f   :  { %946 = vsyncpa [#allocation6], 1 }
 0x260   :  { %947 = vsyncpa [#allocation9], 1 }
 0x261   :  { %948 = vsyncpa [#allocation4], 1 }
 0x262   :  { %950 = vsyncpa [#allocation4 + $0x1], 1 }

</bundles_post_ra>
